<compile_context>
chip_gen: v5e
topology: v5e:2x2
jax: 0.10.0
libtpu: 0.0.40
codegen_flags: <defaults>
</compile_context>

<pallas_src>
import numpy as np

import jax
import jax.numpy as jnp
from jax.experimental import pallas as pl
from jax.experimental.pallas import tpu as pltpu


# --------------------------------------------------------------------------- #
# Kernel
# --------------------------------------------------------------------------- #
def _posenc_kernel(x_ref, pos_ref, o_ref):
    # x_ref: (tile_N, tile_S, D), pos_ref: (tile_S, D) -> broadcast over batch.
    o_ref[...] = x_ref[...] + pos_ref[...]


# --------------------------------------------------------------------------- #
# Host-side sinusoid table (mirrors PositionalEncoding._get_sinusoid_encoding_table)
# --------------------------------------------------------------------------- #
def sinusoid_pos_table(n_position, d_hid):
    j = np.arange(d_hid)
    pos = np.arange(n_position, dtype=np.float64)[:, None]
    angles = pos / np.power(10000.0, 2 * (j // 2) / d_hid)          # (P, D)
    table = np.where(j % 2 == 0, np.sin(angles), np.cos(angles))    # even->sin, odd->cos
    return jnp.asarray(table, dtype=jnp.float32)                    # (P, D)


# --------------------------------------------------------------------------- #
# Tiling heuristics
# --------------------------------------------------------------------------- #
def _choose_tile_s(S, cap=512):
    # tile_S must divide S and be a multiple of 8 (or equal S) for the (8,128) rule.
    if S <= cap:
        return S
    t = cap - (cap % 8)
    while t >= 8:
        if S % t == 0:
            return t
        t -= 8
    return S


def _choose_tile_n(N, tile_s, D, itemsize, target_bytes=2 << 20):
    per_row = max(tile_s * D * itemsize, 1)
    tn = max(1, min(N, target_bytes // per_row))
    while N % tn:           # largest divisor of N <= tn
        tn -= 1
    return tn


# --------------------------------------------------------------------------- #
# Wrapper
# --------------------------------------------------------------------------- #
def positional_encoding(x, pos_table):
    """x: [N, S, D]; pos_table: [n_position, D] with n_position >= S."""
    N, S, D = x.shape
    assert pos_table.shape[0] >= S and pos_table.shape[1] == D
    pos = pos_table[:S].astype(x.dtype)                  # static slice, [S, D]

    itemsize = jnp.dtype(x.dtype).itemsize
    tile_s = _choose_tile_s(S)
    tile_n = _choose_tile_n(N, tile_s, D, itemsize)
    grid = (N // tile_n, S // tile_s)

    # x block + out block + pos block, double-buffered, with 2x headroom.
    block_bytes = (2 * tile_n * tile_s * D + tile_s * D) * itemsize
    vmem_limit = int(min(max(4 * block_bytes, 16 << 20), 64 << 20))

    return pl.pallas_call(
        _posenc_kernel,
        out_shape=jax.ShapeDtypeStruct((N, S, D), x.dtype),
        grid_spec=pltpu.PrefetchScalarGridSpec(
            num_scalar_prefetch=0,
            grid=grid,
            in_specs=[
                pl.BlockSpec((tile_n, tile_s, D), lambda n, s: (n, s, 0)),  # x
                pl.BlockSpec((tile_s, D), lambda n, s: (s, 0)),             # pos table
            ],
            out_specs=pl.BlockSpec((tile_n, tile_s, D), lambda n, s: (n, s, 0)),
        ),
        compiler_params=pltpu.CompilerParams(
            dimension_semantics=("parallel", "parallel"),
            vmem_limit_bytes=vmem_limit,
        ),
    )(x, pos)


# --------------------------------------------------------------------------- #
# Test harness
# --------------------------------------------------------------------------- #
if __name__ == "__main__":
    d_hid = 32
    n_position = 256
    N, S = 2, 8

    key = jax.random.PRNGKey(0)
    x = jax.random.normal(key, (N, S, d_hid), dtype=jnp.float32)
    pos_table = sinusoid_pos_table(n_position, d_hid)

    out = positional_encoding(x, pos_table)
    out = jax.block_until_ready(out)

    # Pure-JAX reference mirroring the PyTorch forward exactly.
    ref = x + pos_table[None, :S, :]

    assert out.shape == (N, S, d_hid)
    assert out.dtype == jnp.float32
    assert jnp.allclose(out, ref, atol=1e-6, rtol=1e-6), "mismatch vs reference"
    print("KERNEL_OK")
</pallas_src>

<mosaic_0001>
module attributes {stable_mosaic.version = 11 : i64} {
  func.func @_posenc_kernel(%arg0: i32, %arg1: i32, %arg2: memref<2x8x32xf32, #tpu.memory_space<vmem>>, %arg3: memref<8x32xf32, #tpu.memory_space<vmem>>, %arg4: memref<2x8x32xf32, #tpu.memory_space<vmem>>) attributes {dimension_semantics = [#tpu.dimension_semantics<parallel>, #tpu.dimension_semantics<parallel>], iteration_bounds = array<i64: 1, 1>, scalar_prefetch = 0 : i64, scratch_operands = 0 : i64, tpu.core_type = #tpu.core_type<tc>, window_params = [{transform_indices = @transform_0, window_bounds = array<i64: 2, 8, 32>}, {transform_indices = @transform_1, window_bounds = array<i64: 8, 32>}, {transform_indices = @transform_2, window_bounds = array<i64: 2, 8, 32>}]} {
    %c0 = arith.constant 0 : index
    %c0_0 = arith.constant 0 : index
    %c0_1 = arith.constant 0 : index
    %0 = vector.load %arg2[%c0, %c0_0, %c0_1] : memref<2x8x32xf32, #tpu.memory_space<vmem>>, vector<2x8x32xf32>
    %c0_2 = arith.constant 0 : index
    %c0_3 = arith.constant 0 : index
    %1 = vector.load %arg3[%c0_2, %c0_3] : memref<8x32xf32, #tpu.memory_space<vmem>>, vector<8x32xf32>
    %2 = vector.shape_cast %1 : vector<8x32xf32> to vector<1x8x32xf32>
    %3 = vector.broadcast %2 : vector<1x8x32xf32> to vector<2x8x32xf32>
    %4 = arith.addf %0, %3 : vector<2x8x32xf32>
    %c0_4 = arith.constant 0 : index
    %c0_5 = arith.constant 0 : index
    %c0_6 = arith.constant 0 : index
    %5 = vector.load %arg4[%c0_4, %c0_5, %c0_6] : memref<2x8x32xf32, #tpu.memory_space<vmem>>, vector<2x8x32xf32>
    tpu.vector_store %arg4[%c0_4, %c0_5, %c0_6], %4 {strides = array<i32>} : memref<2x8x32xf32, #tpu.memory_space<vmem>>, vector<2x8x32xf32>,
    return
  }
  func.func @transform_0(%arg0: i32, %arg1: i32) -> (i32, i32, i32) {
    %c0_i32 = arith.constant 0 : i32
    %c0_i32_0 = arith.constant 0 : i32
    return %arg0, %arg1, %c0_i32 : i32, i32, i32
  }
  func.func @transform_1(%arg0: i32, %arg1: i32) -> (i32, i32) {
    %c0_i32 = arith.constant 0 : i32
    %c0_i32_0 = arith.constant 0 : i32
    return %arg1, %c0_i32 : i32, i32
  }
  func.func @transform_2(%arg0: i32, %arg1: i32) -> (i32, i32, i32) {
    %c0_i32 = arith.constant 0 : i32
    %c0_i32_0 = arith.constant 0 : i32
    return %arg0, %arg1, %c0_i32 : i32, i32, i32
  }
}

</mosaic_0001>

<bundles_post_ra>
// kernel: tpu_custom_call.1
= control target key start
LH: loop header
LB: loop body
LE: loop exit
PB: predicated region body
PF: predicated region fallthrough
CT: control target
= control target key end

     0   :  { %7 = vsyncpa [#allocation3], 0  ;;  %s182_s0 = inlined_call_operand.hbm [shape: f32[2,8,32], index: 0, kind: input, shape index: {}]   ;;  %s183_s1 = inlined_call_operand.hbm [shape: f32[8,32], index: 1, kind: input, shape index: {}]   ;;  %s184_s2 = inlined_call_operand.hbm [shape: f32[2,8,32], index: 2, kind: output, shape index: {}]  }
   0x1   :  { %8 = vsyncpa [#allocation6], 0 }
   0x2   :  { %9 = vsyncpa [#allocation4], 0  ;;  %s14_s11 = sshll.u32 %s182_s0, 4  ;;  %s153_s12 = smov [#allocation2]   ;;  %s15_s11 = int_to_ptr.hbm [resolvable:$true] %s14_s11 }
   0x3   :  { %s16_s13 = sshll.u32 %s153_s12, 4  ;;  %s28_s16 = sshll.u32 %s183_s1, 4  ;;  %s17_s13 = int_to_ptr.vmem [resolvable:$true] %s16_s13  ;;  %s29_s16 = int_to_ptr.hbm [resolvable:$true] %s28_s16 }
   0x4   :  { %s154_s17 = smov 128   ;;  %s155_s18 = smov 8  }
   0x5   :  { %22 = dma.hbm_to_vmem [thread:$0]  %s15_s11, 256, %s17_s13, [#allocation3], %s154_s17, %s154_s17, %s155_s18  }
   0x6   :  { %s156_s19 = smov [#allocation5]  }
   0x7   :  { %s30_s20 = sshll.u32 %s156_s19, 4  ;;  %s31_s20 = int_to_ptr.vmem [resolvable:$true] %s30_s20 }
   0x8   :  { %33 = dma.hbm_to_vmem [thread:$0]  %s29_s16, 128, %s31_s20, [#allocation6]  }
   0x9   :  { %147 = dma.done.wait [#allocation3], 256  }
   0xa   :  { %148 = vsyncadd [#allocation3], 4294967040 }
   0xb   :  { %149 = dma.done.wait [#allocation6], 128  }
   0xc   :  { %150 = vsyncadd [#allocation6], 4294967168  ;;  %s157_s0 = smov [#allocation7]   ;;  %s56_s24 = sshll.u32 %s184_s2, 4  ;;  %v42_v0 = vld [vmem:[#allocation2] sm:$0xff]  ;;  %v44_v1 = vld [vmem:[#allocation5] sm:$0xff]  ;;  %s57_s24 = int_to_ptr.hbm [resolvable:$true] %s56_s24 }
   0xd   :  { %s54_s21 = sshll.u32 %s157_s0, 4  ;;  %vm47_vm0 = vcmask 261120   ;;  %v43_v2 = vld [vmem:[#allocation2 + $0x8] sm:$0xff]  ;;  %v45_v3 = vadd.f32 %v44_v1, %v42_v0  ;;  %s55_s21 = int_to_ptr.vmem [resolvable:$true] %s54_s21 }
   0xe   :  { %v46_v4 = vadd.f32 %v44_v1, %v43_v2 }
   0xf   :  { %48 = vst.msk [vmem:[#allocation7] sm:$0xff] %vm47_vm0, %v45_v3 }
  0x10   :  { %49 = vst.msk [vmem:[#allocation7 + $0x8] sm:$0xff] %vm47_vm0, %v46_v4 }
  0x11   :  { %62 = dma.vmem_to_hbm [thread:$0]  %s55_s21, 256, %s57_s24, [#allocation4], %s154_s17, %s154_s17, %s155_s18  }
  0x12   :  { %151 = dma.done.wait [#allocation4], 256  }
  0x13   :  { %152 = vsyncadd [#allocation4], 4294967040 }
  0x14   :  { %67 = vsyncpa [#allocation3], 1 }
  0x15   :  { %68 = vsyncpa [#allocation6], 1 }
  0x16   :  { %69 = vsyncpa [#allocation4], 1 }

</bundles_post_ra>
